<compile_context>
chip_gen: v7x
topology: tpu7x:2x2x1
jax: 0.10.0
libtpu: 0.0.40
codegen_flags: <defaults>
</compile_context>

<pallas_src>
import functools

import jax
import jax.numpy as jnp
from jax.experimental import pallas as pl
from jax.experimental.pallas import tpu as pltpu


def _charbonnier_kernel(x_ref, y_ref, o_ref, *, eps, rows_in_last, mask_last):
    # grid = (B_virtual, num_tiles); axis 1 walks reduction tiles of one (virtual) row.
    j = pl.program_id(1)

    @pl.when(j == 0)
    def _init():
        o_ref[...] = jnp.zeros_like(o_ref)

    d = x_ref[...].astype(jnp.float32) - y_ref[...].astype(jnp.float32)
    v = jnp.sqrt(d * d + jnp.float32(eps))  # (1, tm, 128), VPU + EUP only

    if mask_last:
        # Only the last tile along the reduction axis can be partial; its out-of-bounds
        # rows contain undefined data and must be zeroed before the reduce.
        last = pl.num_programs(1) - 1

        @pl.when(j != last)
        def _acc_full():
            o_ref[...] += jnp.sum(v, axis=1, keepdims=True)

        @pl.when(j == last)
        def _acc_masked():
            row = jax.lax.broadcasted_iota(jnp.int32, v.shape, 1)
            vm = jnp.where(row < rows_in_last, v, jnp.float32(0.0))
            o_ref[...] += jnp.sum(vm, axis=1, keepdims=True)
    else:
        # Hot path: tree-sum the tile (tm/8 vadds + one XLU sublane reduce) straight
        # into the resident (1, 1, 128) output block.
        o_ref[...] += jnp.sum(v, axis=1, keepdims=True)


def topk_charbonnier_loss(x, y, *, eps=1e-6, keep_ratio=0.5):
    """x, y: (B, C, H, W) arrays. Returns scalar loss (float32).

    Matches TopkCharbonnierLoss.forward: sqrt(diff^2 + eps) summed over C,H,W per
    batch element, top-k (k = max(1, int(B*keep_ratio))) over batch, summed.
    """
    assert x.shape == y.shape and x.ndim == 4
    B, C, H, W = x.shape
    N = C * H * W

    itemsize = jnp.dtype(x.dtype).itemsize
    gran = max(8, 32 // itemsize)  # sublane granularity: 8 f32 / 16 bf16 / 32 int8

    x2 = x.reshape(B, N)
    y2 = y.reshape(B, N)

    pad_elems = 0
    if N % 128 == 0:
        rows = N // 128  # (B, N) -> (B, rows, 128) is a free contiguous reshape
    else:
        # Rare ragged-lane fallback (only when C*H*W % 128 != 0): pad both inputs by
        # <=127 elements per row to the next 128-multiple; every padded position
        # contributes exactly sqrt(eps), which is subtracted back out below.
        rows = -(-N // 128)
        pad_elems = rows * 128 - N
        x2 = jnp.pad(x2, ((0, 0), (0, pad_elems)))
        y2 = jnp.pad(y2, ((0, 0), (0, pad_elems)))

    x3 = x2.reshape(B, rows, 128)
    y3 = y2.reshape(B, rows, 128)

    # v7x has 2 TensorCores; megacore only shards "parallel" grid axes.  For small or
    # odd B, split each batch row into two virtual rows (free contiguous reshape) so
    # the parallel axis is even and both cores stay busy.  Halves re-summed in glue.
    split = 1
    if rows % 2 == 0 and rows >= 2 * gran and (B < 4 or B % 2 == 1):
        split = 2
    Bv = B * split
    rows_v = rows // split
    if split > 1:
        x3 = x3.reshape(Bv, rows_v, 128)
        y3 = y3.reshape(Bv, rows_v, 128)

    # Generation-aware block sizing: ~4 MiB/input on big-VMEM chips (v5e/v6e: 128 MiB),
    # ~2 MiB/input on v7x (64 MiB).  2 inputs x 2 pipeline buffers stays <= 16 MiB.
    try:
        vmem_cap = int(pltpu.get_tpu_info().vmem_capacity_bytes)
    except Exception:
        vmem_cap = 64 << 20  # conservative (v7x-sized) default
    big_vmem = vmem_cap >= (96 << 20)
    block_bytes = (4 << 20) if big_vmem else (2 << 20)
    vmem_limit = (64 << 20) if big_vmem else (32 << 20)

    target_tm = max(gran, (block_bytes // (128 * itemsize)) // gran * gran)
    if rows_v <= target_tm:
        # Single full-extent block along the row axis: no partial blocks, no masking.
        tm = rows_v
        num_tiles = 1
        rows_in_last = tm
        mask_last = False
    else:
        tm = target_tm  # multiple of `gran` (>= 8): satisfies the (8, 128) block rule
        num_tiles = -(-rows_v // tm)
        rows_in_last = rows_v - (num_tiles - 1) * tm
        mask_last = rows_in_last < tm

    kernel = functools.partial(
        _charbonnier_kernel, eps=eps, rows_in_last=rows_in_last, mask_last=mask_last
    )

    partial = pl.pallas_call(
        kernel,
        out_shape=jax.ShapeDtypeStruct((Bv, 1, 128), jnp.float32),
        grid_spec=pltpu.PrefetchScalarGridSpec(
            num_scalar_prefetch=0,
            grid=(Bv, num_tiles),
            in_specs=[
                pl.BlockSpec((1, tm, 128), lambda b, j: (b, j, 0)),
                pl.BlockSpec((1, tm, 128), lambda b, j: (b, j, 0)),
            ],
            # Same output block across the reduction axis -> resident accumulator.
            out_specs=pl.BlockSpec((1, 1, 128), lambda b, j: (b, 0, 0)),
        ),
        compiler_params=pltpu.CompilerParams(
            dimension_semantics=("parallel", "arbitrary"),
            vmem_limit_bytes=vmem_limit,
        ),
    )(x3, y3)

    # (Bv, 1, 128) lane partials -> per-batch scalars (re-merging virtual-row halves).
    batch_loss = jnp.sum(partial.reshape(B, split * 128), axis=1)
    if pad_elems:
        batch_loss = batch_loss - jnp.float32(pad_elems) * jnp.sqrt(jnp.float32(eps))

    # Top-k over B scalars + final sum: trivially small, plain JAX glue
    # (sum of unsorted top-k == sum of sorted top-k).
    k = int(B * keep_ratio)
    if k < 1:
        k = 1
    topk_vals, _ = jax.lax.top_k(batch_loss, k)
    return jnp.sum(topk_vals)


if __name__ == "__main__":
    key = jax.random.PRNGKey(0)
    kx, ky = jax.random.split(key)
    B, C, H, W = 2, 4, 16, 16
    x = jax.random.normal(kx, (B, C, H, W), dtype=jnp.float32)
    y = jax.random.normal(ky, (B, C, H, W), dtype=jnp.float32)

    loss = topk_charbonnier_loss(x, y, eps=1e-6, keep_ratio=0.5)
    jax.block_until_ready(loss)

    # Pure-JAX reference mirroring the PyTorch forward.
    diff = x - y
    l1 = jnp.sqrt(diff * diff + 1e-6)
    batch_loss_ref = jnp.sum(l1, axis=(1, 2, 3))
    k = max(1, int(B * 0.5))
    ref = jnp.sum(jax.lax.top_k(batch_loss_ref, k)[0])
    assert jnp.allclose(loss, ref, rtol=1e-4, atol=1e-3), (loss, ref)

    print("KERNEL_OK")
</pallas_src>

<mosaic_0001>
module attributes {stable_mosaic.version = 11 : i64} {
  func.func @_charbonnier_kernel(%arg0: i32, %arg1: i32, %arg2: memref<1x8x128xf32, #tpu.memory_space<vmem>>, %arg3: memref<1x8x128xf32, #tpu.memory_space<vmem>>, %arg4: memref<1x1x128xf32, #tpu.memory_space<vmem>>) attributes {dimension_semantics = [#tpu.dimension_semantics<parallel>, #tpu.dimension_semantics<arbitrary>], iteration_bounds = array<i64: 2, 1>, scalar_prefetch = 0 : i64, scratch_operands = 0 : i64, tpu.core_type = #tpu.core_type<tc>, window_params = [{transform_indices = @transform_0, window_bounds = array<i64: 1, 8, 128>}, {transform_indices = @transform_1, window_bounds = array<i64: 1, 8, 128>}, {transform_indices = @transform_2, window_bounds = array<i64: 1, 1, 128>}]} {
    %c0_i32 = arith.constant 0 : i32
    %0 = arith.cmpi eq, %arg1, %c0_i32 : i32
    %1 = arith.extui %0 : i1 to i32
    %c0_i32_0 = arith.constant 0 : i32
    %2 = arith.cmpi ne, %1, %c0_i32_0 : i32
    scf.if %2 {
      %cst_13 = arith.constant 0.000000e+00 : f32
      %15 = vector.broadcast %cst_13 : f32 to vector<1x1x128xf32>
      %c0_14 = arith.constant 0 : index
      %c0_15 = arith.constant 0 : index
      %c0_16 = arith.constant 0 : index
      %16 = vector.load %arg4[%c0_14, %c0_15, %c0_16] : memref<1x1x128xf32, #tpu.memory_space<vmem>>, vector<1x1x128xf32>
      tpu.vector_store %arg4[%c0_14, %c0_15, %c0_16], %15 {strides = array<i32>} : memref<1x1x128xf32, #tpu.memory_space<vmem>>, vector<1x1x128xf32>,
    } else {
    }
    %c0 = arith.constant 0 : index
    %c0_1 = arith.constant 0 : index
    %c0_2 = arith.constant 0 : index
    %3 = vector.load %arg2[%c0, %c0_1, %c0_2] : memref<1x8x128xf32, #tpu.memory_space<vmem>>, vector<1x8x128xf32>
    %c0_3 = arith.constant 0 : index
    %c0_4 = arith.constant 0 : index
    %c0_5 = arith.constant 0 : index
    %4 = vector.load %arg3[%c0_3, %c0_4, %c0_5] : memref<1x8x128xf32, #tpu.memory_space<vmem>>, vector<1x8x128xf32>
    %5 = arith.subf %3, %4 : vector<1x8x128xf32>
    %6 = arith.mulf %5, %5 : vector<1x8x128xf32>
    %cst = arith.constant 9.99999997E-7 : f32
    %7 = vector.broadcast %cst : f32 to vector<1x8x128xf32>
    %8 = arith.addf %6, %7 : vector<1x8x128xf32>
    %9 = math.sqrt %8 : vector<1x8x128xf32>
    %c0_6 = arith.constant 0 : index
    %c0_7 = arith.constant 0 : index
    %c0_8 = arith.constant 0 : index
    %10 = vector.load %arg4[%c0_6, %c0_7, %c0_8] : memref<1x1x128xf32, #tpu.memory_space<vmem>>, vector<1x1x128xf32>
    %cst_9 = arith.constant dense<0.000000e+00> : vector<1x128xf32>
    %11 = vector.multi_reduction <add>, %9, %cst_9 [1] : vector<1x8x128xf32> to vector<1x128xf32>
    %12 = vector.shape_cast %11 : vector<1x128xf32> to vector<1x1x128xf32>
    %13 = arith.addf %10, %12 : vector<1x1x128xf32>
    %c0_10 = arith.constant 0 : index
    %c0_11 = arith.constant 0 : index
    %c0_12 = arith.constant 0 : index
    %14 = vector.load %arg4[%c0_10, %c0_11, %c0_12] : memref<1x1x128xf32, #tpu.memory_space<vmem>>, vector<1x1x128xf32>
    tpu.vector_store %arg4[%c0_10, %c0_11, %c0_12], %13 {strides = array<i32>} : memref<1x1x128xf32, #tpu.memory_space<vmem>>, vector<1x1x128xf32>,
    return
  }
  func.func @transform_0(%arg0: i32, %arg1: i32) -> (i32, i32, i32) {
    %c0_i32 = arith.constant 0 : i32
    %c0_i32_0 = arith.constant 0 : i32
    return %arg0, %arg1, %c0_i32 : i32, i32, i32
  }
  func.func @transform_1(%arg0: i32, %arg1: i32) -> (i32, i32, i32) {
    %c0_i32 = arith.constant 0 : i32
    %c0_i32_0 = arith.constant 0 : i32
    return %arg0, %arg1, %c0_i32 : i32, i32, i32
  }
  func.func @transform_2(%arg0: i32, %arg1: i32) -> (i32, i32, i32) {
    %c0_i32 = arith.constant 0 : i32
    %c0_i32_0 = arith.constant 0 : i32
    %c0_i32_1 = arith.constant 0 : i32
    return %arg0, %c0_i32, %c0_i32_0 : i32, i32, i32
  }
}

</mosaic_0001>

<bundles_post_ra>
// kernel: tpu_custom_call.1
= control target key start
LH: loop header
LB: loop body
LE: loop exit
PB: predicated region body
PF: predicated region fallthrough
CT: control target
= control target key end

     0   :  { %7 = vsyncpa [#allocation3], 0  ;;  %s823_s0 = inlined_call_operand.hbm [shape: f32[2,8,128], index: 0, kind: input, shape index: {}]   ;;  %s824_s1 = inlined_call_operand.hbm [shape: f32[2,8,128], index: 1, kind: input, shape index: {}]   ;;  %s825_s2 = inlined_call_operand.hbm [shape: f32[2,1,128], index: 2, kind: output, shape index: {}]  }
   0x1   :  { %9 = vsyncpa [#allocation3 + $0x1], 0 }
   0x2   :  { %10 = vsyncpa [#allocation6], 0 }
   0x3   :  { %12 = vsyncpa [#allocation6 + $0x1], 0 }
   0x4   :  { %13 = vsyncpa [#allocation4], 0 }
   0x5   :  { %15 = vsyncpa [#allocation4 + $0x1], 0  ;;  %s602_s9 = smov 0   ;;  %s604_s10 = smov 0  }
   0x6   :  { %s606_s11 = smov 0   ;;  %s608_s12 = smov 0  }
   0x7   :  { %s610_s13 = smov 0   ;;  %s612_s14 = smov 0  }
   0x8 LB: > { %s351_s15 = sadd.s32 4294967295, %s581_s14   ;;  %s352_s16 = sadd.s32 4294967294, %s581_s14   ;;  %s581_s14 = sphi %s612_s14, %s21_s14   ;;  %s577_s13 = sphi %s610_s13, %s845_s13   ;;  %s573_s12 = sphi %s608_s12, %s844_s12   ;;  %s569_s11 = sphi %s606_s11, %s843_s11   ;;  %s565_s10 = sphi %s604_s10, %s842_s10   ;;  %s561_s9 = sphi %s602_s9, %s841_s9  }
   0x9   : > { %s33_s17 = sadd.s32 1, %s577_s13  ;;  %s42_s18 = sadd.s32 1, %s569_s11 }
   0xa   : > { %p35_p0 = scmp.ge.s32.totalorder %s33_s17, 2  ;;  %p49_p1 = scmp.ne.s32.totalorder %s569_s11, %s565_s10 }
   0xb   : > { %p50_p2 = scmp.eq.s32.totalorder %s581_s14, 0  ;;  %p55_p3 = scmp.ne.s32.totalorder %s565_s10, %s561_s9 }
   0xc   : > { %s847_s17 = smov (%p35_p0, %s33_s17), 0  ;;  %p56_p5 = scmp.eq.s32.totalorder %s351_s15, 0 }
   0xd   : > { %p643_p4 = por %p50_p2, %p49_p1  ;;  %s37_s20 = ssub.s32 %s577_s13, %s847_s17 }
   0xe   : > { %p107_p6 = scmp.eq.s32.totalorder %s351_s15, 1  ;;  %p40_p7 = scmp.eq.s32.totalorder %s37_s20, 0 }
   0xf   : > { %p649_p8 = por %p56_p5, %p55_p3  ;;  %p113_p10 = scmp.eq.s32.totalorder %s352_s16, 1 }
  0x10   : > { %p653_p9 = por %p107_p6, %p49_p1  ;;  %p382_p13 = scmp.lt.s32.totalorder %s581_s14, 2 }
  0x11   : > { %s829_s21 = scalar_select %p649_p8, 1, 0 }
  0x12   : > { %s830_s22 = scalar_select %p653_p9, 1, 0 }
  0x13   : > { %s658_s23 = scalar_select %p40_p7, %s569_s11, %s42_s18  }
  0x14   : > { %p660_p11 = por %p113_p10, %p55_p3  ;;  %s667_s25 = sand.u32 1, %s569_s11  }
  0x15   : > { %s355_s26 = sshll.u32 %s667_s25, 3  ;;  %s356_s27 = sshll.u32 %s577_s13, 7 }
  0x16   : > { %s831_s24 = scalar_select %p660_p11, 1, 0 }
  0x17   : > { %s676_s30 = scalar_lea.hbm %s823_s0, %s356_s27  ;;  %s137_s3 = scalar_lea.vmem [#allocation2], %s355_s26 }
  0x18   : > { %s145_s4 = sshll.u32 %s137_s3, 4  ;;  %p684_p0 = pnand %p382_p13, %p643_p4  ;;  %s680_s4 = int_to_ptr.vmem [resolvable:$true] %s145_s4 }
  0x19   : > { %s134_s6 = scalar_lea.sflag [#allocation3], %s667_s25  ;;  %s435_s7 = scalar_lea.hbm %s676_s30, 128 }
  0x1a   : > { %p436_p3 = scmp.ne.s32.totalorder %s676_s30, %s435_s7  ;;  %p437_p5 = pneg %p684_p0 }
  0x1b   : > { %s440_s16 = scalar_lea.hbm %s823_s0, 256  ;;  %p441_p4 = scmp.lt.u32.totalorder %s676_s30, %s823_s0 }
  0x1c   : > { %p438_p6 = pnand %p437_p5, %p436_p3  ;;  %p442_p10 = scmp.lt.u32.totalorder %s440_s16, %s435_s7 }
  0x1d   : > { %p444_p12 = scmp.lt.u32.totalorder %s435_s7, %s676_s30 }
  0x1e   : > { %p439_p7 = pneg %p438_p6  ;;  %p443_p13 = por %p442_p10, %p441_p4 }
  0x20   : > { %p445_p1 = por %p444_p12, %p443_p13 }
  0x22   : > { %p446_p2 = pnand %p445_p1, %p439_p7 }
  0x24   : > { %449 = shalt.err (!%p446_p2)
}
  0x25   : > { %s450_s20 = scalar_lea.vmem %s680_s4, 128  ;;  %s583_s28 = smov [#allocation2]  }
  0x26   : > { %p451_p3 = scmp.ne.s32.totalorder %s680_s4, %s450_s20  ;;  %s455_s29 = sshll.u32 %s583_s28, 4  ;;  %s456_s29 = int_to_ptr.vmem [resolvable:$false] %s455_s29 }
  0x27   : > { %s457_s3 = scalar_lea.vmem %s456_s29, 256  ;;  %p458_p9 = scmp.lt.s32.totalorder %s680_s4, %s456_s29 }
  0x28   : > { %p453_p6 = pnand %p451_p3, %p437_p5  ;;  %p459_p4 = scmp.lt.s32.totalorder %s457_s3, %s450_s20 }
  0x2a   : > { %p454_p11 = pneg %p453_p6  ;;  %p460_p10 = por %p459_p4, %p458_p9 }
  0x2c   : > { %p461_p12 = pnand %p460_p10, %p454_p11 }
  0x2e   : > { %464 = shalt.err (!%p461_p12)
}
  0x2f   : > { %374 = dma.hbm_to_vmem [thread:$0]  (!%p684_p0), %s676_s30, 128, %s680_s4, %s134_s6  }
  0x30   : > { %p833_p1 = scmp.lt.s32.totalorder %s581_s14, 3  ;;  %p834_p2 = scmp.ge.s32.totalorder %s581_s14, 1 }
  0x31   : > { %s729_s16 = scalar_lea.hbm %s824_s1, %s356_s27  ;;  %s156_s18 = scalar_lea.vmem [#allocation5], %s355_s26 }
  0x32   : > { %p720_p7 = pnand %p834_p2, %p833_p1  ;;  %s164_s19 = sshll.u32 %s156_s18, 4  ;;  %s165_s19 = int_to_ptr.vmem [resolvable:$true] %s164_s19 }
  0x33   : > { %s153_s30 = scalar_lea.sflag [#allocation6], %s667_s25  ;;  %s465_s4 = scalar_lea.hbm %s729_s16, 128 }
  0x34   : > { %s835_s7 = scalar_select %p720_p7, 1, 0 }
  0x35   : > { %p466_p9 = scmp.ne.s32.totalorder %s729_s16, %s465_s4  ;;  %s470_s27 = scalar_lea.hbm %s824_s1, 256 }
  0x36   : > { %p471_p3 = scmp.lt.u32.totalorder %s729_s16, %s824_s1  ;;  %p472_p6 = scmp.lt.u32.totalorder %s470_s27, %s465_s4 }
  0x37   : > { %p468_p11 = pnand %p466_p9, %p437_p5  ;;  %p474_p10 = scmp.lt.u32.totalorder %s465_s4, %s729_s16 }
  0x38   : > { %p473_p4 = por %p472_p6, %p471_p3 }
  0x39   : > { %p469_p13 = pneg %p468_p11 }
  0x3a   : > { %p475_p12 = por %p474_p10, %p473_p4 }
  0x3c   : > { %p476_p1 = pnand %p475_p12, %p469_p13 }
  0x3e   : > { %479 = shalt.err (!%p476_p1)
}
  0x3f   : > { %s480_s25 = scalar_lea.vmem %s165_s19, 128  ;;  %s584_s26 = smov [#allocation5]  }
  0x40   : > { %p481_p2 = scmp.ne.s32.totalorder %s165_s19, %s480_s25  ;;  %s485_s3 = sshll.u32 %s584_s26, 4  ;;  %s486_s3 = int_to_ptr.vmem [resolvable:$false] %s485_s3 }
  0x41   : > { %s487_s8 = scalar_lea.vmem %s486_s3, 256  ;;  %p488_p8 = scmp.lt.s32.totalorder %s165_s19, %s486_s3 }
  0x42   : > { %p483_p9 = pnand %p481_p2, %p437_p5  ;;  %p489_p7 = scmp.lt.s32.totalorder %s487_s8, %s480_s25 }
  0x44   : > { %p484_p11 = pneg %p483_p9  ;;  %p490_p3 = por %p489_p7, %p488_p8 }
  0x46   : > { %p491_p6 = pnand %p490_p3, %p484_p11 }
  0x48   : > { %494 = shalt.err (!%p491_p6)
}
  0x49   : > { %377 = dma.hbm_to_vmem [thread:$0]  (!%p684_p0), %s729_s16, 128, %s165_s19, %s153_s30  }
  0x4a   : > { %p836_p13 = scmp.ne.s32.totalorder %s835_s7, 0 }
  0x4b   : > { %s756_s15 = sand.u32 (!%p836_p13), 1, %s565_s10   ;;  %p837_p5 = scmp.ne.s32.totalorder (!%p836_p13), %s829_s21, 0 }
  0x4c   : > { %173 = sbr.rel (%p836_p13) target bundleno = 136 (0x88), region = 28  ;;  %s360_s18 = sshll.u32 (!%p836_p13), %s756_s15, 3 }
  0x4d   : > { %s176_s4 = scalar_lea.sflag (!%p836_p13), [#allocation3], %s756_s15  ;;  %s179_s6 = scalar_lea.vmem (!%p836_p13), [#allocation2], %s360_s18 }
  0x53   : > { %548 = dma.done.wait (%p837_p5), %s176_s4, 128  }
  0x54   : > { %550 = vsyncadd (%p837_p5), %s176_s4, 4294967168  ;;  %s185_s5 = scalar_lea.sflag [#allocation6], %s756_s15  ;;  %s188_s16 = scalar_lea.vmem [#allocation5], %s360_s18 }
  0x55   : > { %552 = dma.done.wait (%p837_p5), %s185_s5, 128  }
  0x56   : > { %554 = vsyncadd (%p837_p5), %s185_s5, 4294967168  ;;  %s212_s7 = scalar_lea.vmem [#allocation7], %s756_s15  ;;  %v585_v0 = vmov 0.0   ;;  %v218_v1 = vld [vmem:[%s179_s6] sm:$0xff]  ;;  %v219_v2 = vld [vmem:[%s188_s16] sm:$0xff]  ;;  %s362_s21 = sshll.u32 %s573_s12, 4 }
  0x57   : > { %217 = vst [vmem:[%s212_s7] sm:$0x1] %v585_v0  ;;  %v220_v3 = vsub.f32 %v218_v1, %v219_v2  ;;  %s252_s19 = sshll.u32 %s212_s7, 4  ;;  %s774_s27 = scalar_lea.hbm %s825_s2, %s362_s21  ;;  %s776_s19 = int_to_ptr.vmem [resolvable:$true] %s252_s19 }
  0x58   : > { %s240_s28 = scalar_lea.sflag [#allocation4], %s756_s15  ;;  %s495_s29 = scalar_lea.vmem %s776_s19, 16 }
  0x59   : > { %v221_v4 = vmul.f32 %v220_v3, %v220_v3  ;;  %p496_p8 = scmp.ne.s32.totalorder %s776_s19, %s495_s29  ;;  %p838_p0 = scmp.ne.s32.totalorder %s830_s22, 0 }
  0x5a   : > { %s586_s12 = smov [#allocation7]  }
  0x5b   : > { %v222_v5 = vadd.f32 1e-06, %v221_v4  ;;  %p497_p7 = pnand %p496_p8, %p838_p0  ;;  %s499_s25 = sshll.u32 %s586_s12, 4  ;;  %s500_s25 = int_to_ptr.vmem [resolvable:$false] %s499_s25 }
  0x5c   : > { %s501_s26 = scalar_lea.vmem %s500_s25, 32  ;;  %p502_p10 = scmp.lt.s32.totalorder %s776_s19, %s500_s25 }
  0x5d   : > { %433 = vrsqrt.f32 %v222_v5  ;;  %vm225_vm0 = vcmp.eq.f32.partialorder %v222_v5, inf  ;;  %v228_v7 = vand.u32 2147483648, %v222_v5  ;;  %vm227_vm1 = vcmp.eq.f32.partialorder %v222_v5, 0.0  ;;  %p498_p4 = pneg %p497_p7  ;;  %p503_p12 = scmp.lt.s32.totalorder %s501_s26, %s495_s29 }
  0x5e   : > { %v230_v16 = vld [vmem:[%s212_s7] sm:$0x1] }
  0x5f   : > { %p504_p1 = por %p503_p12, %p502_p10 }
  0x61   : > { %p505_p2 = pnand %p504_p1, %p498_p4 }
  0x67   : > { %v434_v6 = vpop.eup %433 }
  0x68   : > { %v224_v8 = vmul.f32 %v434_v6, %v222_v5 }
  0x6a   : > { %v226_v9 = vsel %vm225_vm0, %v222_v5, %v224_v8 }
  0x6b   : > { %v229_v10 = vsel %vm227_vm1, %v228_v7, %v226_v9 }
  0x6c   : > { %v231_v11 = vrot.slane %v229_v10, 4 }
  0x6e   : > { %v232_v12 = vadd.f32 %v231_v11, %v229_v10 }
  0x70   : > { %v233_v13 = vrot.slane %v232_v12, 2 }
  0x72   : > { %v234_v14 = vadd.f32 %v233_v13, %v232_v12 }
  0x74   : > { %v235_v15 = vrot.slane %v234_v14, 1 }
  0x76   : > { %v236_v17 = vadd.f32 %v235_v15, %v234_v14 }
  0x78   : > { %v237_v18 = vadd.f32 %v236_v17, %v230_v16 }
  0x7a   : > { %238 = vst [vmem:[%s212_s7] sm:$0x1] %v237_v18 }
  0x7b   : > { %508 = shalt.err (!%p505_p2)
}
  0x7c   : > { %s509_s3 = scalar_lea.hbm %s774_s27, 16  ;;  %s513_s18 = scalar_lea.hbm %s825_s2, 32 }
  0x7d   : > { %p510_p9 = scmp.ne.s32.totalorder %s774_s27, %s509_s3  ;;  %p514_p6 = scmp.lt.u32.totalorder %s774_s27, %s825_s2 }
  0x7e   : > { %p515_p13 = scmp.lt.u32.totalorder %s513_s18, %s509_s3  ;;  %p517_p8 = scmp.lt.u32.totalorder %s509_s3, %s774_s27 }
  0x7f   : > { %p511_p11 = pnand %p510_p9, %p838_p0 }
  0x80   : > { %p516_p5 = por %p515_p13, %p514_p6 }
  0x81   : > { %p512_p3 = pneg %p511_p11 }
  0x82   : > { %p518_p7 = por %p517_p8, %p516_p5 }
  0x84   : > { %p519_p4 = pnand %p518_p7, %p512_p3 }
  0x86   : > { %522 = shalt.err (!%p519_p4)
}
  0x87   : > { %369 = dma.vmem_to_hbm [thread:$0]  (%p838_p0), %s776_s19, 16, %s774_s27, %s240_s28  }
  0x88 PF: > { %s264_s5 = sand.u32 1, %s561_s9   ;;  %p839_p10 = scmp.ne.s32.totalorder %s831_s24, 0 }
  0x89   : > { %p840_p12 = scmp.ge.s32.totalorder %s581_s14, 2  ;;  %s265_s16 = scalar_lea.sflag [#allocation4], %s264_s5 }
  0x8b   : > { %p379_p1 = pnand %p840_p12, %p839_p10 }
  0x8d   : > { %556 = dma.done.wait (!%p379_p1), %s265_s16, 16  }
  0x8e   : > { %558 = vsyncadd (!%p379_p1), %s265_s16, 4294967280  ;;  %s21_s14 = sadd.s32 1, %s581_s14   ;;  %s841_s9 = smov %s565_s10 }
  0x8f   : > { %p18_p2 = scmp.ge.s32.totalorder %s21_s14, 4   ;;  %s842_s10 = smov %s569_s11 }
  0x90   : > { %s843_s11 = smov %s658_s23  ;;  %s844_s12 = smov %s577_s13 }
  0x91   : > { %s845_s13 = smov %s847_s17  ;;  %20 = sbr.rel (!%p18_p2) target bundleno = 8 (0x8), region = 90 }
  0x98   :  { %269 = vsyncpa [#allocation3], 1 }
  0x99   :  { %271 = vsyncpa [#allocation3 + $0x1], 1 }
  0x9a   :  { %272 = vsyncpa [#allocation6], 1 }
  0x9b   :  { %274 = vsyncpa [#allocation6 + $0x1], 1 }
  0x9c   :  { %275 = vsyncpa [#allocation4], 1 }
  0x9d   :  { %277 = vsyncpa [#allocation4 + $0x1], 1 }

</bundles_post_ra>
